<compile_context>
chip_gen: v7x
topology: tpu7x:2x2x1
jax: 0.10.0
libtpu: 0.0.40
codegen_flags: <defaults>
</compile_context>

<pallas_src>
import numpy as np
import jax
import jax.numpy as jnp
from jax.experimental import pallas as pl
from jax.experimental.pallas import tpu as pltpu

# ----------------------------- configuration -------------------------------
HIDDEN = 32          # hidden_channels
NUM_LAYERS = 3       # num_layers
MAX_Z = 10           # max_z
NUM_GRAPHS = 2       # batch size (number of graphs)
N_NODES = 40         # total nodes in the batch (26 + 14)

# ----------------- packed parameter slab layout (rows, width=HIDDEN) --------
R_ZTAB = 0                                   # [0, 40)  z_table @ Wg0^T, padded to N rows
R_WG   = R_ZTAB + N_NODES                    # [40, 104) Wg[1], Wg[2] in x@W layout
R_BG   = R_WG + (NUM_LAYERS - 1) * HIDDEN    # 104..106: bg[0..2] (one row each), pad to 8
R_W1   = R_BG + 8                            # [112, 144) lin1 weight (x@W layout)
R_W2   = R_W1 + HIDDEN                       # [144, 176) lin2 weight, only column 0 real
R_B1   = R_W2 + HIDDEN                       # 176: lin1 bias row
R_B2   = R_B1 + 1                            # 177: lin2 bias row (only column 0 real)
PARAM_ROWS = R_B1 + 8                        # 184 rows total (multiple of 8)


# --------------------------- fused Pallas kernel ----------------------------
def gcn_kernel(cidx_ref, data_ref, par_ref, o_ref, x_scr, pair_scr):
    a   = data_ref[0:N_NODES, :]                        # [N, N] normalized adjacency
    zoh = data_ref[N_NODES:2 * N_NODES, :]              # [N, N] padded one-hot(z)

    # Embedding lookup with Wg[0] already folded into the table (exact: one-hot
    # selection commutes with the weight matmul).
    x = jnp.dot(zoh, par_ref[R_ZTAB:R_ZTAB + N_NODES, :],
                preferred_element_type=jnp.float32)     # [N, H] == emb(z) @ Wg0^T

    # GCNConv stack: relu after every conv except the last one (matches forward()).
    for l in range(NUM_LAYERS):
        ax = jnp.dot(a, x, preferred_element_type=jnp.float32)
        if l > 0:
            wg = par_ref[R_WG + (l - 1) * HIDDEN:R_WG + l * HIDDEN, :]
            ax = jnp.dot(ax, wg, preferred_element_type=jnp.float32)
        h = ax + par_ref[R_BG + l:R_BG + l + 1, :]
        x = jnp.maximum(h, 0.0) if l < NUM_LAYERS - 1 else h
        # F.dropout(p=0.5) in eval mode -> identity.

    # Center-pair pooling x[c] * x[c+1]; indices come from SMEM, rows are read
    # with dynamic sublane slices out of a VMEM scratch holding the node slab.
    # (Assumes every graph has >= 2 nodes so c+1 stays inside its graph.)
    x_scr[...] = x
    for g in range(NUM_GRAPHS):
        ci = cidx_ref[g]
        xs = x_scr[pl.ds(ci, 1), :]                     # [1, H]
        xd = x_scr[pl.ds(ci + 1, 1), :]                 # [1, H]
        pair_scr[g:g + 1, :] = xs * xd

    pair = pair_scr[...]                                # [B, H]
    h1 = jnp.maximum(
        jnp.dot(pair, par_ref[R_W1:R_W1 + HIDDEN, :],
                preferred_element_type=jnp.float32)
        + par_ref[R_B1:R_B1 + 1, :], 0.0)               # relu(lin1)
    # F.dropout(p=0.5) in eval mode -> identity.
    # lin2: weight/bias live in column 0 of their slabs; other columns are zero.
    o_ref[...] = (jnp.dot(h1, par_ref[R_W2:R_W2 + HIDDEN, :],
                          preferred_element_type=jnp.float32)
                  + par_ref[R_B2:R_B2 + 1, :])          # [B, H], column 0 is the answer


@jax.jit
def gcn_forward(center_idx, data_slab, param_slab):
    vmem = pl.BlockSpec(memory_space=pltpu.MemorySpace.VMEM)
    smem = pl.BlockSpec(memory_space=pltpu.MemorySpace.SMEM)
    out = pl.pallas_call(
        gcn_kernel,
        out_shape=jax.ShapeDtypeStruct((NUM_GRAPHS, HIDDEN), jnp.float32),
        in_specs=[smem, vmem, vmem],
        out_specs=vmem,
        scratch_shapes=[pltpu.VMEM((N_NODES, HIDDEN), jnp.float32),
                        pltpu.VMEM((NUM_GRAPHS, HIDDEN), jnp.float32)],
    )(center_idx, data_slab, param_slab)
    return out[:, :1]                                   # [B, 1]


# -------------------------------- JAX glue -----------------------------------
def build_a_hat(edge_index, edge_weight, n):
    # TODO(synk): sparse edge-list scatter -> dense normalized adjacency has no
    # clean Pallas equivalent; built once in plain JAX (A_hat = D^-1/2 (A+I) D^-1/2).
    src, dst = edge_index[0], edge_index[1]
    a = jnp.zeros((n, n), jnp.float32).at[dst, src].add(edge_weight)
    a = a + jnp.eye(n, dtype=jnp.float32)               # self loops, weight 1
    deg = a.sum(axis=1)
    dinv = jnp.where(deg > 0, jax.lax.rsqrt(deg), 0.0)
    return dinv[:, None] * a * dinv[None, :]


def pack_data_slab(a_hat, z):
    zoh = jax.nn.one_hot(z, N_NODES, dtype=jnp.float32)   # [N, N], cols >= MAX_Z zero
    return jnp.concatenate([a_hat, zoh], axis=0)          # [2N, N]


def pack_param_slab(t):
    slab = np.zeros((PARAM_ROWS, HIDDEN), np.float32)
    ztab_folded = np.asarray(t['z_table'] @ t['Wg'][0].T)            # [MAX_Z, H]
    slab[R_ZTAB:R_ZTAB + MAX_Z, :] = ztab_folded
    for l in range(1, NUM_LAYERS):
        slab[R_WG + (l - 1) * HIDDEN:R_WG + l * HIDDEN, :] = np.asarray(t['Wg'][l]).T
    for l in range(NUM_LAYERS):
        slab[R_BG + l, :] = np.asarray(t['bg'][l])
    slab[R_W1:R_W1 + HIDDEN, :] = np.asarray(t['Wlin1']).T
    slab[R_W2:R_W2 + HIDDEN, 0] = np.asarray(t['Wlin2'])[0, :]       # only column 0 real
    slab[R_B1, :] = np.asarray(t['blin1'])
    slab[R_B2, 0] = np.asarray(t['blin2'])[0]
    return jnp.asarray(slab)


# -------------------------- deterministic parameters --------------------------
def make_torch_layout_params(key):
    ks = jax.random.split(key, 7)

    def rnd(k, shape, scale=0.2):
        return (scale * jax.random.normal(k, shape)).astype(jnp.float32)

    t = {}
    t['z_table'] = rnd(ks[0], (MAX_Z, HIDDEN), 0.5)           # Embedding(max_z, H)
    t['Wg'] = rnd(ks[1], (NUM_LAYERS, HIDDEN, HIDDEN))        # GCNConv weights, [out, in]
    t['bg'] = rnd(ks[2], (NUM_LAYERS, HIDDEN), 0.05)
    t['Wlin1'] = rnd(ks[3], (HIDDEN, HIDDEN))                 # lin1 [out, in]
    t['blin1'] = rnd(ks[4], (HIDDEN,), 0.05)
    t['Wlin2'] = rnd(ks[5], (1, HIDDEN))                      # lin2 [out, in]
    t['blin2'] = rnd(ks[6], (1,), 0.05)
    return t


# ------------------------- pure-JAX torch-semantics reference ----------------
def reference_forward(a_hat, z, center_idx, t):
    x = t['z_table'][z]
    for l in range(NUM_LAYERS - 1):
        x = jax.nn.relu(a_hat @ x @ t['Wg'][l].T + t['bg'][l])
    x = a_hat @ x @ t['Wg'][-1].T + t['bg'][-1]               # last conv: no relu
    h = x[center_idx] * x[center_idx + 1]                     # center-pair pooling
    h = jax.nn.relu(h @ t['Wlin1'].T + t['blin1'])
    return h @ t['Wlin2'].T + t['blin2']                      # [B, 1]


# ------------------------------------ main ------------------------------------
if __name__ == "__main__":
    key = jax.random.PRNGKey(0)
    k_param, k_z = jax.random.split(key, 2)
    t_params = make_torch_layout_params(k_param)

    # Two-graph batch: 26 + 14 nodes, nodes contiguous per graph.
    n0, n1 = 26, 14
    assert n0 + n1 == N_NODES
    batch_np = np.concatenate([np.zeros(n0, np.int32), np.ones(n1, np.int32)])
    e0 = [(i, i + 1) for i in range(n0 - 1)] + [(0, 13), (5, 20)]
    e1 = [(n0 + i, n0 + i + 1) for i in range(n1 - 1)] + [(n0, n0 + 7)]
    e = e0 + e1
    src = jnp.array([a for a, b in e] + [b for a, b in e], jnp.int32)
    dst = jnp.array([b for a, b in e] + [a for a, b in e], jnp.int32)
    edge_index = jnp.stack([src, dst])                        # symmetric
    edge_weight = jnp.ones((src.shape[0],), jnp.float32)
    z_data = jax.random.randint(k_z, (N_NODES,), 0, MAX_Z)    # data.z

    # center_indices: first node of each graph (torch: np.unique(batch, return_index=True)).
    _, center_idx_np = np.unique(batch_np, return_index=True)
    center_idx = jnp.asarray(center_idx_np, jnp.int32)

    # Kernel inputs: one data slab, one parameter slab, one SMEM index vector.
    a_hat = build_a_hat(edge_index, edge_weight, N_NODES)     # [N, N]
    data_slab = pack_data_slab(a_hat, z_data)                 # [2N, N]
    param_slab = pack_param_slab(t_params)                    # [PARAM_ROWS, H]

    out = jax.block_until_ready(gcn_forward(center_idx, data_slab, param_slab))
    ref = reference_forward(a_hat, z_data, center_idx, t_params)

    assert out.shape == (NUM_GRAPHS, 1)
    assert jnp.allclose(out, ref, rtol=1e-3, atol=1e-3), "fused GCN kernel mismatch"
    print("KERNEL_OK")
</pallas_src>

<mosaic_0001>
module attributes {stable_mosaic.version = 11 : i64} {
  func.func @gcn_kernel(%arg0: memref<2xi32, #tpu.memory_space<smem>>, %arg1: memref<80x40xf32, #tpu.memory_space<vmem>>, %arg2: memref<184x32xf32, #tpu.memory_space<vmem>>, %arg3: memref<2x32xf32, #tpu.memory_space<vmem>>, %arg4: memref<40x32xf32, #tpu.memory_space<vmem>>, %arg5: memref<2x32xf32, #tpu.memory_space<vmem>>) attributes {dimension_semantics = [], scalar_prefetch = 0 : i64, scratch_operands = 2 : i64, tpu.core_type = #tpu.core_type<tc>} {
    %c0 = arith.constant 0 : index
    %c0_0 = arith.constant 0 : index
    %0 = vector.load %arg1[%c0, %c0_0] : memref<80x40xf32, #tpu.memory_space<vmem>>, vector<40x40xf32>
    %c40 = arith.constant 40 : index
    %c0_1 = arith.constant 0 : index
    %1 = vector.load %arg1[%c40, %c0_1] : memref<80x40xf32, #tpu.memory_space<vmem>>, vector<40x40xf32>
    %c0_2 = arith.constant 0 : index
    %c0_3 = arith.constant 0 : index
    %2 = vector.load %arg2[%c0_2, %c0_3] : memref<184x32xf32, #tpu.memory_space<vmem>>, vector<40x32xf32>
    %cst = arith.constant dense<0.000000e+00> : vector<40x32xf32>
    %3 = tpu.matmul %1, %2, %cst {dimension_numbers = #tpu.dot_dimension_numbers<[1], [0], [0], [1], [0, 0, 1, 1], [], []>} : vector<40x40xf32>, vector<40x32xf32>, vector<40x32xf32> -> vector<40x32xf32>
    %cst_4 = arith.constant dense<0.000000e+00> : vector<40x32xf32>
    %4 = tpu.matmul %0, %3, %cst_4 {dimension_numbers = #tpu.dot_dimension_numbers<[1], [0], [0], [1], [0, 0, 1, 1], [], []>} : vector<40x40xf32>, vector<40x32xf32>, vector<40x32xf32> -> vector<40x32xf32>
    %c104 = arith.constant 104 : index
    %c0_5 = arith.constant 0 : index
    %5 = vector.load %arg2[%c104, %c0_5] : memref<184x32xf32, #tpu.memory_space<vmem>>, vector<1x32xf32>
    %6 = vector.broadcast %5 : vector<1x32xf32> to vector<40x32xf32>
    %7 = arith.addf %4, %6 : vector<40x32xf32>
    %cst_6 = arith.constant 0.000000e+00 : f32
    %8 = vector.broadcast %cst_6 : f32 to vector<40x32xf32>
    %9 = arith.maximumf %7, %8 : vector<40x32xf32>
    %cst_7 = arith.constant dense<0.000000e+00> : vector<40x32xf32>
    %10 = tpu.matmul %0, %9, %cst_7 {dimension_numbers = #tpu.dot_dimension_numbers<[1], [0], [0], [1], [0, 0, 1, 1], [], []>} : vector<40x40xf32>, vector<40x32xf32>, vector<40x32xf32> -> vector<40x32xf32>
    %c40_8 = arith.constant 40 : index
    %c0_9 = arith.constant 0 : index
    %11 = vector.load %arg2[%c40_8, %c0_9] : memref<184x32xf32, #tpu.memory_space<vmem>>, vector<32x32xf32>
    %cst_10 = arith.constant dense<0.000000e+00> : vector<40x32xf32>
    %12 = tpu.matmul %10, %11, %cst_10 {dimension_numbers = #tpu.dot_dimension_numbers<[1], [0], [0], [1], [0, 0, 1, 1], [], []>} : vector<40x32xf32>, vector<32x32xf32>, vector<40x32xf32> -> vector<40x32xf32>
    %c105 = arith.constant 105 : index
    %c0_11 = arith.constant 0 : index
    %13 = vector.load %arg2[%c105, %c0_11] : memref<184x32xf32, #tpu.memory_space<vmem>>, vector<1x32xf32>
    %14 = vector.broadcast %13 : vector<1x32xf32> to vector<40x32xf32>
    %15 = arith.addf %12, %14 : vector<40x32xf32>
    %cst_12 = arith.constant 0.000000e+00 : f32
    %16 = vector.broadcast %cst_12 : f32 to vector<40x32xf32>
    %17 = arith.maximumf %15, %16 : vector<40x32xf32>
    %cst_13 = arith.constant dense<0.000000e+00> : vector<40x32xf32>
    %18 = tpu.matmul %0, %17, %cst_13 {dimension_numbers = #tpu.dot_dimension_numbers<[1], [0], [0], [1], [0, 0, 1, 1], [], []>} : vector<40x40xf32>, vector<40x32xf32>, vector<40x32xf32> -> vector<40x32xf32>
    %c72 = arith.constant 72 : index
    %c0_14 = arith.constant 0 : index
    %19 = vector.load %arg2[%c72, %c0_14] : memref<184x32xf32, #tpu.memory_space<vmem>>, vector<32x32xf32>
    %cst_15 = arith.constant dense<0.000000e+00> : vector<40x32xf32>
    %20 = tpu.matmul %18, %19, %cst_15 {dimension_numbers = #tpu.dot_dimension_numbers<[1], [0], [0], [1], [0, 0, 1, 1], [], []>} : vector<40x32xf32>, vector<32x32xf32>, vector<40x32xf32> -> vector<40x32xf32>
    %c106 = arith.constant 106 : index
    %c0_16 = arith.constant 0 : index
    %21 = vector.load %arg2[%c106, %c0_16] : memref<184x32xf32, #tpu.memory_space<vmem>>, vector<1x32xf32>
    %22 = vector.broadcast %21 : vector<1x32xf32> to vector<40x32xf32>
    %23 = arith.addf %20, %22 : vector<40x32xf32>
    %c0_17 = arith.constant 0 : index
    %c0_18 = arith.constant 0 : index
    %24 = vector.load %arg4[%c0_17, %c0_18] : memref<40x32xf32, #tpu.memory_space<vmem>>, vector<40x32xf32>
    tpu.vector_store %arg4[%c0_17, %c0_18], %23 {strides = array<i32>} : memref<40x32xf32, #tpu.memory_space<vmem>>, vector<40x32xf32>,
    %c0_19 = arith.constant 0 : index
    %25 = memref.load %arg0[%c0_19] : memref<2xi32, #tpu.memory_space<smem>>
    %26 = arith.index_cast %25 : i32 to index
    %c0_20 = arith.constant 0 : index
    %27 = vector.load %arg4[%26, %c0_20] : memref<40x32xf32, #tpu.memory_space<vmem>>, vector<1x32xf32>
    %c1_i32 = arith.constant 1 : i32
    %28 = arith.addi %25, %c1_i32 : i32
    %29 = arith.index_cast %28 : i32 to index
    %c0_21 = arith.constant 0 : index
    %30 = vector.load %arg4[%29, %c0_21] : memref<40x32xf32, #tpu.memory_space<vmem>>, vector<1x32xf32>
    %31 = arith.mulf %27, %30 : vector<1x32xf32>
    %c0_22 = arith.constant 0 : index
    %c0_23 = arith.constant 0 : index
    %32 = vector.load %arg5[%c0_22, %c0_23] : memref<2x32xf32, #tpu.memory_space<vmem>>, vector<1x32xf32>
    tpu.vector_store %arg5[%c0_22, %c0_23], %31 {strides = array<i32>} : memref<2x32xf32, #tpu.memory_space<vmem>>, vector<1x32xf32>,
    %c1 = arith.constant 1 : index
    %33 = memref.load %arg0[%c1] : memref<2xi32, #tpu.memory_space<smem>>
    %34 = arith.index_cast %33 : i32 to index
    %c0_24 = arith.constant 0 : index
    %35 = vector.load %arg4[%34, %c0_24] : memref<40x32xf32, #tpu.memory_space<vmem>>, vector<1x32xf32>
    %c1_i32_25 = arith.constant 1 : i32
    %36 = arith.addi %33, %c1_i32_25 : i32
    %37 = arith.index_cast %36 : i32 to index
    %c0_26 = arith.constant 0 : index
    %38 = vector.load %arg4[%37, %c0_26] : memref<40x32xf32, #tpu.memory_space<vmem>>, vector<1x32xf32>
    %39 = arith.mulf %35, %38 : vector<1x32xf32>
    %c1_27 = arith.constant 1 : index
    %c0_28 = arith.constant 0 : index
    %40 = vector.load %arg5[%c1_27, %c0_28] : memref<2x32xf32, #tpu.memory_space<vmem>>, vector<1x32xf32>
    tpu.vector_store %arg5[%c1_27, %c0_28], %39 {strides = array<i32>} : memref<2x32xf32, #tpu.memory_space<vmem>>, vector<1x32xf32>,
    %c0_29 = arith.constant 0 : index
    %c0_30 = arith.constant 0 : index
    %41 = vector.load %arg5[%c0_29, %c0_30] : memref<2x32xf32, #tpu.memory_space<vmem>>, vector<2x32xf32>
    %c112 = arith.constant 112 : index
    %c0_31 = arith.constant 0 : index
    %42 = vector.load %arg2[%c112, %c0_31] : memref<184x32xf32, #tpu.memory_space<vmem>>, vector<32x32xf32>
    %cst_32 = arith.constant dense<0.000000e+00> : vector<2x32xf32>
    %43 = tpu.matmul %41, %42, %cst_32 {dimension_numbers = #tpu.dot_dimension_numbers<[1], [0], [0], [1], [0, 0, 1, 1], [], []>} : vector<2x32xf32>, vector<32x32xf32>, vector<2x32xf32> -> vector<2x32xf32>
    %c176 = arith.constant 176 : index
    %c0_33 = arith.constant 0 : index
    %44 = vector.load %arg2[%c176, %c0_33] : memref<184x32xf32, #tpu.memory_space<vmem>>, vector<1x32xf32>
    %45 = vector.broadcast %44 : vector<1x32xf32> to vector<2x32xf32>
    %46 = arith.addf %43, %45 : vector<2x32xf32>
    %cst_34 = arith.constant 0.000000e+00 : f32
    %47 = vector.broadcast %cst_34 : f32 to vector<2x32xf32>
    %48 = arith.maximumf %46, %47 : vector<2x32xf32>
    %c144 = arith.constant 144 : index
    %c0_35 = arith.constant 0 : index
    %49 = vector.load %arg2[%c144, %c0_35] : memref<184x32xf32, #tpu.memory_space<vmem>>, vector<32x32xf32>
    %cst_36 = arith.constant dense<0.000000e+00> : vector<2x32xf32>
    %50 = tpu.matmul %48, %49, %cst_36 {dimension_numbers = #tpu.dot_dimension_numbers<[1], [0], [0], [1], [0, 0, 1, 1], [], []>} : vector<2x32xf32>, vector<32x32xf32>, vector<2x32xf32> -> vector<2x32xf32>
    %c177 = arith.constant 177 : index
    %c0_37 = arith.constant 0 : index
    %51 = vector.load %arg2[%c177, %c0_37] : memref<184x32xf32, #tpu.memory_space<vmem>>, vector<1x32xf32>
    %52 = vector.broadcast %51 : vector<1x32xf32> to vector<2x32xf32>
    %53 = arith.addf %50, %52 : vector<2x32xf32>
    %c0_38 = arith.constant 0 : index
    %c0_39 = arith.constant 0 : index
    %54 = vector.load %arg3[%c0_38, %c0_39] : memref<2x32xf32, #tpu.memory_space<vmem>>, vector<2x32xf32>
    tpu.vector_store %arg3[%c0_38, %c0_39], %53 {strides = array<i32>} : memref<2x32xf32, #tpu.memory_space<vmem>>, vector<2x32xf32>,
    return
  }
}

</mosaic_0001>

<bundles_post_ra>
// kernel: gcn_forward.1
= control target key start
LH: loop header
LB: loop body
LE: loop exit
PB: predicated region body
PF: predicated region fallthrough
CT: control target
= control target key end

     0   :  { %8 = vsyncpa [#allocation5], 0  ;;  %s1504_s0 = inlined_call_operand.vmem [shape: s32[2], index: 0, kind: input, shape index: {}]   ;;  %s1505_s1 = inlined_call_operand.vmem [shape: f32[80,40], index: 1, kind: input, shape index: {}]   ;;  %s1506_s2 = inlined_call_operand.vmem [shape: f32[184,32], index: 2, kind: input, shape index: {}]   ;;  %s1507_s3 = inlined_call_operand.vmem [shape: f32[2,32], index: 3, kind: output, shape index: {}]  }
   0x1   :  { %s15_s14 = sshll.u32 %s1504_s0, 4  ;;  %s16_s14 = int_to_ptr.vmem [resolvable:$true] %s15_s14 }
   0x2   :  { %s1206_s15 = scalar_lea.vmem %s16_s14, 16  ;;  %p1211_p1 = scmp.lt.s32.totalorder %s16_s14, %s16_s14 }
   0x3   :  { %p1207_p0 = scmp.ne.s32.totalorder %s16_s14, %s1206_s15  ;;  %p1212_p2 = scmp.lt.s32.totalorder %s1206_s15, %s1206_s15 }
   0x5   :  { %p1213_p3 = por %p1212_p2, %p1211_p1 }
   0x7   :  { %p1214_p4 = pnand %p1213_p3, %p1207_p0 }
   0x9   :  { %1217 = shalt.err (!%p1214_p4)
}
   0xa   :  { %s1220_s16 = smov [#allocation4]  }
   0xb   :  { %18 = dma.vmem_to_smem %s16_s14, 16, %s1220_s16, [#allocation5]  }
   0xc   :  { %1218 = dma.done.wait [#allocation5], 16  }
   0xd   :  { %1219 = vsyncadd [#allocation5], 4294967280 }
   0xe   :  { %26 = sfence }
   0xf   :  { %v37_v0 = vld [vmem:[%s1506_s2] sm:$0xff]  ;;  %v38_v1 = vld [vmem:[%s1506_s2 + $0x8] sm:$0xff]  ;;  %v39_v2 = vld [vmem:[%s1506_s2 + $0x10] sm:$0xff]  ;;  %v1221_v3 = vmov 0.0|0.0   ;;  %vm1222_vm0 = vmmov 0   ;;  %v1223_v6 = vmov 0.0  }
  0x10   :  { %1154 = vmatprep.subr.bf16.mxu0 %v1221_v3  ;;  %v1155_v4 = vpack.c.bf16 %v38_v1, %v37_v0  ;;  %v40_v5 = vld [vmem:[%s1506_s2 + $0x18] sm:$0xff]  ;;  %996 = vmatprep.mubr.msk.f32.mxu0 %vm1222_vm0, %v1223_v6  ;;  %v41_v8 = vld [vmem:[%s1506_s2 + $0x20] sm:$0xff]  ;;  %v32_v9 = vld [vmem:[%s1505_s1 + $0x28] sm:$0xff]  ;;  %vm42_vm1 = vcmask 326656   ;;  %vm362_vm2 = vcmask 261120   ;;  %s682_s23 = sld [smem:[#allocation4]] }
  0x11   :  { %1160 = vmatprep.subr.bf16.mxu1 %v1221_v3  ;;  %1021 = vmatprep.mubr.msk.f32.mxu1 %vm1222_vm0, %v1223_v6  ;;  %v1158_v7 = vpack.c.bf16 %v40_v5, %v39_v2  ;;  %v33_v10 = vld [vmem:[%s1505_s1 + $0x30] sm:$0xff]  ;;  %v34_v11 = vld [vmem:[%s1505_s1 + $0x38] sm:$0xff]  ;;  %v35_v12 = vld [vmem:[%s1505_s1 + $0x40] sm:$0xff]  ;;  %vm689_vm3 = vcmask 253952   ;;  %vm865_vm4 = vcmask 254976  }
  0x12   :  { %1156 = vmatpush3.bf16.msra.mxu0 %v1155_v4  ;;  %v36_v13 = vld [vmem:[%s1505_s1 + $0x48] sm:$0xff]  ;;  %v1306_v26 = vld [vmem:[%s1505_s1] sm:$0xff]  ;;  %v1325_v28 = vld [vmem:[%s1505_s1 + $0x10] sm:$0xff] }
  0x13   :  { %1157 = vmatprep.subr.bf16.mxu0 %v1221_v3  ;;  %v1316_v27 = vld [vmem:[%s1505_s1 + $0x8] sm:$0xff]  ;;  %v1334_v29 = vld [vmem:[%s1505_s1 + $0x18] sm:$0xff]  ;;  %v1343_v30 = vld [vmem:[%s1505_s1 + $0x20] sm:$0xff]  ;;  %s912_s1 = sld [smem:[#allocation4 + $0x1]] }
  0x14   :  { %v353_v31 = vld [vmem:[%s1506_s2 + $0x28] sm:$0xff]  ;;  %v354_v32 = vld [vmem:[%s1506_s2 + $0x30] sm:$0xff]  ;;  %v355_v33 = vld [vmem:[%s1506_s2 + $0x38] sm:$0xff] }
  0x15   :  { %v1173_v34 = vpack.c.bf16 %v354_v32, %v353_v31  ;;  %v356_v35 = vld [vmem:[%s1506_s2 + $0x40] sm:$0xff]  ;;  %v883_v37 = vld [vmem:[%s1506_s2 + $0x68] ss:$0 sm:$0xff] }
  0x16   :  { %1159 = vmatpush3.bf16.msra.mxu0 %v1158_v7  ;;  %v1176_v36 = vpack.c.bf16 %v356_v35, %v355_v33  ;;  %s683_s24 = scalar_lea.vmem [#allocation2], %s682_s23 }
  0x17   :  { %994 = vmatprep.subr.mxu0 %v1223_v6 }
  0x19   :  { %s692_s25 = scalar_lea.vmem [#allocation2], %s912_s1 }
  0x1a   :  { %995 = vmatpush3.msra.mxu0 %v41_v8  ;;  %v563_v8 = vld [vmem:[%s1506_s2 + $0x48] sm:$0xff] }
  0x1b   :  { %997 = vmatmul.mubr.msk.f32.vlgmr.msra.gmra.mrb[0].mxu0 %vm42_vm1, %v32_v9  ;;  %1166 = vmatprep.subr.bf16.mxu0 %v1221_v3  ;;  %v564_v9 = vld [vmem:[%s1506_s2 + $0x50] sm:$0xff] }
  0x1c   :  { %999 = vmatprep.mubr.msk.f32.mxu0 %vm1222_vm0, %v1223_v6 }
  0x1f   :  { %1000 = vmatmul.mubr.msk.f32.gmra.mrb[2].mxu0 %vm42_vm1, %v33_v10  ;;  %v565_v10 = vld [vmem:[%s1506_s2 + $0x58] sm:$0xff] }
  0x20   :  { %1002 = vmatprep.mubr.msk.f32.mxu0 %vm1222_vm0, %v1223_v6 }
  0x23   :  { %1003 = vmatmul.mubr.msk.f32.gmra.mrb[4].mxu0 %vm42_vm1, %v34_v11  ;;  %v1185_v11 = vpack.c.bf16 %v564_v9, %v563_v8 }
  0x24   :  { %1005 = vmatprep.mubr.msk.f32.mxu0 %vm1222_vm0, %v1223_v6 }
  0x27   :  { %1006 = vmatmul.mubr.msk.f32.gmra.mrb[6].mxu0 %vm42_vm1, %v35_v12  ;;  %v566_v12 = vld [vmem:[%s1506_s2 + $0x60] sm:$0xff] }
  0x28   :  { %1008 = vmatprep.mubr.msk.f32.mxu0 %vm1222_vm0, %v1223_v6 }
  0x2b   :  { %1009 = vmatmul.mubr.msk.f32.gmra.mrb[8].mxu0 %vm42_vm1, %v36_v13  ;;  %v1188_v13 = vpack.c.bf16 %v566_v12, %v565_v10 }
  0x2c   :  { %1046 = vmatprep.mubr.msk.f32.mxu0 %vm1222_vm0, %v1223_v6 }
  0xee   :  { %v124_v14 = vpop.f32.mrb[0].mxu0 }
  0xef   :  { %v998_v15 = vpop.f32.mrb[1].mxu0 }
  0xf2   :  { %v129_v16 = vpop.f32.mrb[2].mxu0 }
  0xf3   :  { %v1161_v17 = vpack.c.bf16 %v129_v16, %v124_v14  ;;  %v1001_v18 = vpop.f32.mrb[3].mxu0  ;;  %v894_v14 = vld [vmem:[%s1506_s2 + $0x69] ss:$0 sm:$0xff] }
  0xf5   :  { %1162 = vmatpush3.bf16.msra.mxu1 %v1161_v17 }
  0xf6   :  { %v134_v19 = vpop.f32.mrb[4].mxu0  ;;  %1163 = vmatprep.subr.bf16.mxu1 %v1221_v3 }
  0xf7   :  { %v1004_v20 = vpop.f32.mrb[5].mxu0 }
  0xfa   :  { %v139_v21 = vpop.f32.mrb[6].mxu0 }
  0xfb   :  { %v1164_v22 = vpack.c.bf16 %v139_v21, %v134_v19  ;;  %v1007_v23 = vpop.f32.mrb[7].mxu0 }
  0xfd   :  { %1165 = vmatpush3.bf16.msra.mxu1 %v1164_v22 }
  0xfe   :  { %v144_v24 = vpop.f32.mrb[8].mxu0  ;;  %1019 = vmatprep.subr.mxu1 %v1223_v6 }
  0xff   :  { %v1010_v25 = vpop.f32.mrb[9].mxu0 }
 0x101   :  { %1020 = vmatpush3.msra.mxu1 %v144_v24 }
 0x102   :  { %1022 = vmatmul.mubr.msk.f32.vlgmr.msra.gmra.mrb[0].mxu1 %vm42_vm1, %v1306_v26  ;;  %1172 = vmatprep.subr.bf16.mxu1 %v1221_v3 }
 0x103   :  { %1024 = vmatprep.mubr.msk.f32.mxu1 %vm1222_vm0, %v1223_v6  ;;  %1174 = vmatpush3.bf16.msra.mxu1 %v1173_v34 }
 0x104   :  { %1175 = vmatprep.subr.bf16.mxu1 %v1221_v3 }
 0x106   :  { %1025 = vmatmul.mubr.msk.f32.gmra.mrb[2].mxu1 %vm42_vm1, %v1316_v27 }
 0x107   :  { %1027 = vmatprep.mubr.msk.f32.mxu1 %vm1222_vm0, %v1223_v6  ;;  %1177 = vmatpush3.bf16.msra.mxu1 %v1176_v36 }
 0x108   :  { %1184 = vmatprep.subr.bf16.mxu1 %v1221_v3 }
 0x10a   :  { %1028 = vmatmul.mubr.msk.f32.gmra.mrb[4].mxu1 %vm42_vm1, %v1325_v28 }
 0x10b   :  { %1030 = vmatprep.mubr.msk.f32.mxu1 %vm1222_vm0, %v1223_v6 }
 0x10e   :  { %1031 = vmatmul.mubr.msk.f32.gmra.mrb[6].mxu1 %vm42_vm1, %v1334_v29 }
 0x10f   :  { %1033 = vmatprep.mubr.msk.f32.mxu1 %vm1222_vm0, %v1223_v6 }
 0x112   :  { %1034 = vmatmul.mubr.msk.f32.gmra.mrb[8].mxu1 %vm42_vm1, %v1343_v30 }
 0x113   :  { %1069 = vmatprep.mubr.msk.f32.mxu1 %vm1222_vm0, %v1223_v6 }
 0x1d5   :  { %v234_v38 = vpop.f32.mrb[0].mxu1 }
 0x1d6   :  { %v1023_v39 = vpop.f32.mrb[1].mxu1  ;;  %v235_v40 = vadd.f32 %v883_v37, %v234_v38 }
 0x1d8   :  { %v258_v44 = vmax.f32 %v235_v40, 0.0 }
 0x1d9   :  { %v239_v41 = vpop.f32.mrb[2].mxu1 }
 0x1da   :  { %v240_v42 = vadd.f32 %v883_v37, %v239_v41  ;;  %v1026_v43 = vpop.f32.mrb[3].mxu1 }
 0x1dc   :  { %v259_v45 = vmax.f32 %v240_v42, 0.0 }
 0x1dd   :  { %v244_v46 = vpop.f32.mrb[4].mxu1 }
 0x1de   :  { %v1167_v47 = vpack.c.bf16 %v259_v45, %v258_v44  ;;  %v1029_v48 = vpop.f32.mrb[5].mxu1  ;;  %v245_v49 = vadd.f32 %v883_v37, %v244_v46 }
 0x1df   :  { %v701_v48 = vld [vmem:[%s1506_s2 + $0x78] sm:$0xff] }
 0x1e0   :  { %1168 = vmatpush3.bf16.msra.mxu0 %v1167_v47  ;;  %v260_v53 = vmax.f32 %v245_v49, 0.0  ;;  %v700_v47 = vld [vmem:[%s1506_s2 + $0x70] sm:$0xff] }
 0x1e1   :  { %v249_v50 = vpop.f32.mrb[6].mxu1  ;;  %1169 = vmatprep.subr.bf16.mxu0 %v1221_v3  ;;  %v1191_v49 = vpack.c.bf16 %v701_v48, %v700_v47 }
 0x1e2   :  { %v250_v51 = vadd.f32 %v883_v37, %v249_v50  ;;  %v1032_v52 = vpop.f32.mrb[7].mxu1  ;;  %v702_v50 = vld [vmem:[%s1506_s2 + $0x80] sm:$0xff] }
 0x1e4   :  { %v261_v54 = vmax.f32 %v250_v51, 0.0  ;;  %v703_v51 = vld [vmem:[%s1506_s2 + $0x88] sm:$0xff] }
 0x1e5   :  { %v254_v55 = vpop.f32.mrb[8].mxu1  ;;  %v1194_v52 = vpack.c.bf16 %v703_v51, %v702_v50 }
 0x1e6   :  { %v1170_v56 = vpack.c.bf16 %v261_v54, %v260_v53  ;;  %v255_v57 = vadd.f32 %v883_v37, %v254_v55  ;;  %v1035_v58 = vpop.f32.mrb[9].mxu1  ;;  %v784_v53 = vld [vmem:[%s1506_s2 + $0x98] sm:$0xff]  ;;  %v905_v55 = vld [vmem:[%s1506_s2 + $0x6a] ss:$0 sm:$0xff] }
 0x1e8   :  { %v262_v59 = vmax.f32 %v255_v57, 0.0  ;;  %1171 = vmatpush3.bf16.msra.mxu0 %v1170_v56 }
 0x1e9   :  { %1044 = vmatprep.subr.mxu0 %v1223_v6 }
 0x1ec   :  { %1045 = vmatpush3.msra.mxu0 %v262_v59 }
 0x1ed   :  { %1047 = vmatmul.mubr.msk.f32.vlgmr.msra.gmra.mrb[10].mxu0 %vm42_vm1, %v1306_v26  ;;  %1178 = vmatprep.subr.bf16.mxu0 %v1221_v3 }
 0x1ee   :  { %1049 = vmatprep.mubr.msk.f32.mxu0 %vm1222_vm0, %v1223_v6 }
 0x1f1   :  { %1050 = vmatmul.mubr.msk.f32.gmra.mrb[12].mxu0 %vm42_vm1, %v1316_v27 }
 0x1f2   :  { %1052 = vmatprep.mubr.msk.f32.mxu0 %vm1222_vm0, %v1223_v6 }
 0x1f5   :  { %1053 = vmatmul.mubr.msk.f32.gmra.mrb[14].mxu0 %vm42_vm1, %v1325_v28 }
 0x1f6   :  { %1055 = vmatprep.mubr.msk.f32.mxu0 %vm1222_vm0, %v1223_v6 }
 0x1f9   :  { %1056 = vmatmul.mubr.msk.f32.gmra.mrb[16].mxu0 %vm42_vm1, %v1334_v29 }
 0x1fa   :  { %1058 = vmatprep.mubr.msk.f32.mxu0 %vm1222_vm0, %v1223_v6 }
 0x1fd   :  { %1059 = vmatmul.mubr.msk.f32.gmra.mrb[18].mxu0 %vm42_vm1, %v1343_v30 }
 0x1fe   :  { %1094 = vmatprep.mubr.msk.f32.mxu0 %vm1222_vm0, %v1223_v6 }
 0x2c0   :  { %v329_v60 = vpop.f32.mrb[10].mxu0 }
 0x2c1   :  { %v1048_v61 = vpop.f32.mrb[11].mxu0  ;;  %1070 = vmatmul.mubr.msk.f32.vlgmr.msra.gmra.mrb[10].mxu1 %vm362_vm2, %v329_v60 }
 0x2c2   :  { %1072 = vmatprep.mubr.msk.f32.mxu1 %vm1222_vm0, %v1223_v6  ;;  %1186 = vmatpush3.bf16.msra.mxu1 %v1185_v11 }
 0x2c3   :  { %1187 = vmatprep.subr.bf16.mxu1 %v1221_v3 }
 0x2c4   :  { %v334_v62 = vpop.f32.mrb[12].mxu0 }
 0x2c5   :  { %v1051_v63 = vpop.f32.mrb[13].mxu0  ;;  %1073 = vmatmul.mubr.msk.f32.gmra.mrb[12].mxu1 %vm362_vm2, %v334_v62 }
 0x2c6   :  { %1075 = vmatprep.mubr.msk.f32.mxu1 %vm1222_vm0, %v1223_v6  ;;  %1189 = vmatpush3.bf16.msra.mxu1 %v1188_v13 }
 0x2c7   :  { %1196 = vmatprep.subr.bf16.mxu1 %v1221_v3 }
 0x2c8   :  { %v339_v0 = vpop.f32.mrb[14].mxu0 }
 0x2c9   :  { %v1054_v1 = vpop.f32.mrb[15].mxu0  ;;  %1076 = vmatmul.mubr.msk.f32.gmra.mrb[14].mxu1 %vm362_vm2, %v339_v0 }
 0x2ca   :  { %1078 = vmatprep.mubr.msk.f32.mxu1 %vm1222_vm0, %v1223_v6 }
 0x2cc   :  { %v344_v2 = vpop.f32.mrb[16].mxu0 }
 0x2cd   :  { %v1057_v4 = vpop.f32.mrb[17].mxu0  ;;  %1079 = vmatmul.mubr.msk.f32.gmra.mrb[16].mxu1 %vm362_vm2, %v344_v2 }
 0x2ce   :  { %1081 = vmatprep.mubr.msk.f32.mxu1 %vm1222_vm0, %v1223_v6 }
 0x2d0   :  { %v349_v5 = vpop.f32.mrb[18].mxu0 }
 0x2d1   :  { %1082 = vmatmul.mubr.msk.f32.gmra.mrb[18].mxu1 %vm362_vm2, %v349_v5  ;;  %v1060_v7 = vpop.f32.mrb[19].mxu0 }
 0x2d2   :  { %1117 = vmatprep.mubr.msk.f32.mxu1 %vm1222_vm0, %v1223_v6 }
 0x394   :  { %v444_v15 = vpop.f32.mrb[10].mxu1 }
 0x395   :  { %v1071_v16 = vpop.f32.mrb[11].mxu1  ;;  %v445_v17 = vadd.f32 %v894_v14, %v444_v15  ;;  %v785_v15 = vld [vmem:[%s1506_s2 + $0xa0] sm:$0xff] }
 0x396   :  { %v786_v16 = vld [vmem:[%s1506_s2 + $0xa8] sm:$0xff] }
 0x397   :  { %v468_v21 = vmax.f32 %v445_v17, 0.0  ;;  %v1200_v17 = vpack.c.bf16 %v786_v16, %v785_v15 }
 0x398   :  { %v449_v18 = vpop.f32.mrb[12].mxu1 }
 0x399   :  { %v450_v19 = vadd.f32 %v894_v14, %v449_v18  ;;  %v1074_v20 = vpop.f32.mrb[13].mxu1  ;;  %v914_v18 = vld [vmem:[%s1506_s2 + $0xb0] ss:$0 sm:$0xff] }
 0x39b   :  { %v469_v22 = vmax.f32 %v450_v19, 0.0 }
 0x39c   :  { %v454_v23 = vpop.f32.mrb[14].mxu1 }
 0x39d   :  { %v1179_v24 = vpack.c.bf16 %v469_v22, %v468_v21  ;;  %v1077_v25 = vpop.f32.mrb[15].mxu1  ;;  %v455_v31 = vadd.f32 %v894_v14, %v454_v23  ;;  %v916_v23 = vld [vmem:[%s1506_s2 + $0xb1] ss:$0 sm:$0xff] }
 0x39f   :  { %1180 = vmatpush3.bf16.msra.mxu0 %v1179_v24  ;;  %v470_v35 = vmax.f32 %v455_v31, 0.0 }
 0x3a0   :  { %v459_v32 = vpop.f32.mrb[16].mxu1  ;;  %1181 = vmatprep.subr.bf16.mxu0 %v1221_v3 }
 0x3a1   :  { %v460_v33 = vadd.f32 %v894_v14, %v459_v32  ;;  %v1080_v34 = vpop.f32.mrb[17].mxu1 }
 0x3a3   :  { %v471_v36 = vmax.f32 %v460_v33, 0.0 }
 0x3a4   :  { %v464_v37 = vpop.f32.mrb[18].mxu1 }
 0x3a5   :  { %v1182_v38 = vpack.c.bf16 %v471_v36, %v470_v35  ;;  %v465_v39 = vadd.f32 %v894_v14, %v464_v37  ;;  %v1083_v40 = vpop.f32.mrb[19].mxu1 }
 0x3a7   :  { %v472_v41 = vmax.f32 %v465_v39, 0.0  ;;  %1183 = vmatpush3.bf16.msra.mxu0 %v1182_v38 }
 0x3a8   :  { %1092 = vmatprep.subr.mxu0 %v1223_v6 }
 0x3ab   :  { %1093 = vmatpush3.msra.mxu0 %v472_v41 }
 0x3ac   :  { %1095 = vmatmul.mubr.msk.f32.vlgmr.msra.gmra.mrb[20].mxu0 %vm42_vm1, %v1306_v26  ;;  %1190 = vmatprep.subr.bf16.mxu0 %v1221_v3 }
 0x3ad   :  { %1097 = vmatprep.mubr.msk.f32.mxu0 %vm1222_vm0, %v1223_v6  ;;  %1192 = vmatpush3.bf16.msra.mxu0 %v1191_v49 }
 0x3ae   :  { %1193 = vmatprep.subr.bf16.mxu0 %v1221_v3 }
 0x3b0   :  { %1098 = vmatmul.mubr.msk.f32.gmra.mrb[22].mxu0 %vm42_vm1, %v1316_v27 }
 0x3b1   :  { %1100 = vmatprep.mubr.msk.f32.mxu0 %vm1222_vm0, %v1223_v6  ;;  %1195 = vmatpush3.bf16.msra.mxu0 %v1194_v52 }
 0x3b4   :  { %1101 = vmatmul.mubr.msk.f32.gmra.mrb[24].mxu0 %vm42_vm1, %v1325_v28 }
 0x3b5   :  { %1103 = vmatprep.mubr.msk.f32.mxu0 %vm1222_vm0, %v1223_v6 }
 0x3b8   :  { %1104 = vmatmul.mubr.msk.f32.gmra.mrb[26].mxu0 %vm42_vm1, %v1334_v29 }
 0x3b9   :  { %1106 = vmatprep.mubr.msk.f32.mxu0 %vm1222_vm0, %v1223_v6 }
 0x3bc   :  { %1107 = vmatmul.mubr.msk.f32.gmra.mrb[28].mxu0 %vm42_vm1, %v1343_v30 }
 0x3bd   :  { %1140 = vmatprep.mubr.msk.f32.mxu0 %vm1222_vm0, %v1223_v6 }
 0x47f   :  { %v539_v26 = vpop.f32.mrb[20].mxu0 }
 0x480   :  { %1118 = vmatmul.mubr.msk.f32.vlgmr.msra.gmra.mrb[20].mxu1 %vm362_vm2, %v539_v26  ;;  %v1096_v27 = vpop.f32.mrb[21].mxu0 }
 0x481   :  { %1120 = vmatprep.mubr.msk.f32.mxu1 %vm1222_vm0, %v1223_v6 }
 0x483   :  { %v544_v28 = vpop.f32.mrb[22].mxu0 }
 0x484   :  { %1121 = vmatmul.mubr.msk.f32.gmra.mrb[22].mxu1 %vm362_vm2, %v544_v28  ;;  %v1099_v29 = vpop.f32.mrb[23].mxu0 }
 0x485   :  { %1123 = vmatprep.mubr.msk.f32.mxu1 %vm1222_vm0, %v1223_v6 }
 0x487   :  { %v549_v42 = vpop.f32.mrb[24].mxu0 }
 0x488   :  { %1124 = vmatmul.mubr.msk.f32.gmra.mrb[24].mxu1 %vm362_vm2, %v549_v42  ;;  %v1102_v30 = vpop.f32.mrb[25].mxu0 }
 0x489   :  { %1126 = vmatprep.mubr.msk.f32.mxu1 %vm1222_vm0, %v1223_v6 }
 0x48b   :  { %v554_v43 = vpop.f32.mrb[26].mxu0 }
 0x48c   :  { %1127 = vmatmul.mubr.msk.f32.gmra.mrb[26].mxu1 %vm362_vm2, %v554_v43  ;;  %v1105_v44 = vpop.f32.mrb[27].mxu0 }
 0x48d   :  { %1129 = vmatprep.mubr.msk.f32.mxu1 %vm1222_vm0, %v1223_v6 }
 0x48f   :  { %v559_v45 = vpop.f32.mrb[28].mxu0 }
 0x490   :  { %1130 = vmatmul.mubr.msk.f32.gmra.mrb[28].mxu1 %vm362_vm2, %v559_v45  ;;  %v1108_v46 = vpop.f32.mrb[29].mxu0 }
 0x491   :  { %1151 = vmatprep.mubr.msk.f32.mxu1 %vm1222_vm0, %v1223_v6  ;;  %v783_v6 = vld [vmem:[%s1506_s2 + $0x90] sm:$0xff] }
 0x492   :  { %v1197_v54 = vpack.c.bf16 %v784_v53, %v783_v6 }
 0x494   :  { %1198 = vmatpush3.bf16.msra.mxu1 %v1197_v54 }
 0x495   :  { %1199 = vmatprep.subr.bf16.mxu1 %v1221_v3 }
 0x498   :  { %1201 = vmatpush3.bf16.msra.mxu1 %v1200_v17 }
 0x553   :  { %v653_v56 = vpop.f32.mrb[20].mxu1 }
 0x554   :  { %v654_v57 = vadd.f32 %v905_v55, %v653_v56  ;;  %v1119_v58 = vpop.f32.mrb[21].mxu1 }
 0x556   :  { %677 = vst.msk [vmem:[#allocation2] sm:$0xff] %vm362_vm2, %v654_v57 }
 0x557   :  { %v658_v59 = vpop.f32.mrb[22].mxu1 }
 0x558   :  { %v659_v60 = vadd.f32 %v905_v55, %v658_v59  ;;  %v1122_v61 = vpop.f32.mrb[23].mxu1 }
 0x55a   :  { %678 = vst.msk [vmem:[#allocation2 + $0x8] sm:$0xff] %vm362_vm2, %v659_v60 }
 0x55b   :  { %v663_v62 = vpop.f32.mrb[24].mxu1 }
 0x55c   :  { %v664_v63 = vadd.f32 %v905_v55, %v663_v62  ;;  %v1125_v0 = vpop.f32.mrb[25].mxu1 }
 0x55e   :  { %679 = vst.msk [vmem:[#allocation2 + $0x10] sm:$0xff] %vm362_vm2, %v664_v63 }
 0x55f   :  { %v668_v3 = vpop.f32.mrb[26].mxu1 }
 0x560   :  { %v669_v1 = vadd.f32 %v905_v55, %v668_v3  ;;  %v1128_v2 = vpop.f32.mrb[27].mxu1 }
 0x562   :  { %680 = vst.msk [vmem:[#allocation2 + $0x18] sm:$0xff] %vm362_vm2, %v669_v1 }
 0x563   :  { %v673_v4 = vpop.f32.mrb[28].mxu1 }
 0x564   :  { %v674_v5 = vadd.f32 %v905_v55, %v673_v4  ;;  %v1131_v7 = vpop.f32.mrb[29].mxu1 }
 0x566   :  { %681 = vst.msk [vmem:[#allocation2 + $0x20] sm:$0xff] %vm362_vm2, %v674_v5 }
 0x56d   :  { %v684_v8 = vld [vmem:[%s683_s24] sm:$0x1]  ;;  %v911_v9 = vld [vmem:[%s683_s24 + $0x1] sm:$0x1] }
 0x56e   :  { %v693_v10 = vld [vmem:[%s692_s25] sm:$0x1]  ;;  %v688_v11 = vmul.f32 %v911_v9, %v684_v8  ;;  %v913_v12 = vld [vmem:[%s692_s25 + $0x1] sm:$0x1] }
 0x56f   :  { %v697_v13 = vmul.f32 %v913_v12, %v693_v10 }
 0x570   :  { %690 = vst.msk [vmem:[#allocation3] sm:$0x1] %vm689_vm3, %v688_v11 }
 0x571   :  { %698 = vst.msk [vmem:[#allocation3 + $0x1] sm:$0x1] %vm689_vm3, %v697_v13 }
 0x578   :  { %v699_v14 = vld [vmem:[#allocation3] sm:$0x3] }
 0x579   :  { %1141 = vmatmul.mubr.msk.f32.vlgmr.msra.gmra.mrb[30].mxu0 %vm362_vm2, %v699_v14 }
 0x64c   :  { %v778_v19 = vpop.f32.mrb[30].mxu0 }
 0x64d   :  { %v779_v20 = vadd.f32 %v914_v18, %v778_v19  ;;  %v1142_v21 = vpop.f32.mrb[31].mxu0 }
 0x64f   :  { %v782_v22 = vmax.f32 %v779_v20, 0.0 }
 0x651   :  { %1152 = vmatmul.mubr.msk.f32.vlgmr.msra.gmra.mrb[30].mxu1 %vm362_vm2, %v782_v22 }
 0x724   :  { %v861_v24 = vpop.f32.mrb[30].mxu1 }
 0x725   :  { %v862_v25 = vadd.f32 %v916_v23, %v861_v24  ;;  %v1153_v31 = vpop.f32.mrb[31].mxu1 }
 0x727   :  { %866 = vst.msk [vmem:[%s1507_s3] sm:$0x3] %vm865_vm4, %v862_v25 }
 0x728   :  { %871 = vsyncpa [#allocation5], 1 }

</bundles_post_ra>
